<compile_context>
chip_gen: v6e
topology: v6e:2x2x1
jax: 0.10.0
libtpu: 0.0.40
codegen_flags: <defaults>
</compile_context>

<pallas_src>
import jax
import jax.numpy as jnp
from jax.experimental import pallas as pl
from jax.experimental.pallas import tpu as pltpu

EPS = 1e-5
LANE = 128
SUBLANE = 8


def _round_up(n, m):
    return ((n + m - 1) // m) * m


# ---------------------------------------------------------------------------
# Kernel: 4 matmuls + 3 ReLUs per batch tile (BN already folded into weights).
# ---------------------------------------------------------------------------
def _autoencoder_kernel(x_ref,
                        w1_ref, b1_ref,
                        w2_ref, b2_ref,
                        w3_ref, b3_ref,
                        w4_ref, b4_ref,
                        out_ref):
    cdt = w1_ref.dtype  # matmul operand dtype (f32 or bf16); accumulation f32.

    x = x_ref[...].astype(cdt)
    h = jnp.dot(x, w1_ref[...], preferred_element_type=jnp.float32) + b1_ref[...]
    h = jnp.maximum(h, 0.0)

    h = jnp.dot(h.astype(cdt), w2_ref[...], preferred_element_type=jnp.float32) + b2_ref[...]
    h = jnp.maximum(h, 0.0)

    h = jnp.dot(h.astype(cdt), w3_ref[...], preferred_element_type=jnp.float32) + b3_ref[...]
    h = jnp.maximum(h, 0.0)

    y = jnp.dot(h.astype(cdt), w4_ref[...], preferred_element_type=jnp.float32) + b4_ref[...]
    out_ref[...] = y.astype(out_ref.dtype)


# ---------------------------------------------------------------------------
# Parameter preparation: BN fold + lane padding.
# ---------------------------------------------------------------------------
def fold_and_pad_params(p, *, compute_dtype=jnp.float32):
    """Fold eval-mode BatchNorm affine into the FOLLOWING Linear (valid because
    Dropout is identity in eval and BN immediately precedes the next Linear),
    then zero-pad every feature dim to a multiple of 128 lanes (exact)."""

    def bn_affine(g, be, m, v):
        scale = g * jax.lax.rsqrt(v + EPS)   # (1, C)
        shift = be - m * scale               # (1, C)
        return scale, shift

    s1, t1 = bn_affine(p["g1"], p["be1"], p["m1"], p["v1"])
    s2, t2 = bn_affine(p["g2"], p["be2"], p["m2"], p["v2"])
    s3, t3 = bn_affine(p["g3"], p["be3"], p["m3"], p["v3"])

    w1, b1 = p["w1"], p["b1"]
    w2 = s1.reshape(-1, 1) * p["w2"]
    b2 = t1 @ p["w2"] + p["b2"]
    w3 = s2.reshape(-1, 1) * p["w3"]
    b3 = t2 @ p["w3"] + p["b3"]
    w4 = s3.reshape(-1, 1) * p["w4"]
    b4 = t3 @ p["w4"] + p["b4"]

    in_dim, h1 = w1.shape
    h2 = w2.shape[1]
    out_dim = w4.shape[1]
    in_p = _round_up(in_dim, LANE)
    h1_p = _round_up(h1, LANE)
    h2_p = _round_up(h2, LANE)
    out_p = _round_up(out_dim, LANE)

    def pad_w(w, rows, cols):
        return jnp.pad(w, ((0, rows - w.shape[0]), (0, cols - w.shape[1])))

    def pad_b(b, cols):
        return jnp.pad(b, ((0, 0), (0, cols - b.shape[1])))

    return {
        "w1": pad_w(w1, in_p, h1_p).astype(compute_dtype),
        "b1": pad_b(b1, h1_p).astype(jnp.float32),
        "w2": pad_w(w2, h1_p, h2_p).astype(compute_dtype),
        "b2": pad_b(b2, h2_p).astype(jnp.float32),
        "w3": pad_w(w3, h2_p, h1_p).astype(compute_dtype),
        "b3": pad_b(b3, h1_p).astype(jnp.float32),
        "w4": pad_w(w4, h1_p, out_p).astype(compute_dtype),
        "b4": pad_b(b4, out_p).astype(jnp.float32),
        "in_dim": in_dim,
        "out_dim": out_dim,
    }


# ---------------------------------------------------------------------------
# Wrapper: batch-tiled pallas_call with VMEM-resident weights.
# ---------------------------------------------------------------------------
def my_autoencoder_forward(x, fp, *, tb=512):
    """x: [B, input_size] float32. fp: output of fold_and_pad_params.

    tb is an upper bound on the batch tile; the actual tile is the largest
    multiple of 8 that does not exceed min(tb, round_up(B, 8))."""
    B, D = x.shape
    assert D == fp["in_dim"], "input feature size mismatch"

    in_p = fp["w1"].shape[0]
    out_p = fp["w4"].shape[1]

    # Batch tile: multiple of the f32 sublane count, never larger than needed.
    tb = max(SUBLANE, min(_round_up(tb, SUBLANE), _round_up(B, SUBLANE)))
    b_p = _round_up(B, tb)

    if (b_p != B) or (in_p != D):
        x = jnp.pad(x, ((0, b_p - B), (0, in_p - D)))

    grid = (b_p // tb,)

    def _resident(shape):
        # Weight/bias blocks: full array, same block every grid step.
        return pl.BlockSpec(shape, lambda i: (0, 0))

    in_specs = [
        pl.BlockSpec((tb, in_p), lambda i: (i, 0)),        # x (batch-tiled)
        _resident(fp["w1"].shape), _resident(fp["b1"].shape),
        _resident(fp["w2"].shape), _resident(fp["b2"].shape),
        _resident(fp["w3"].shape), _resident(fp["b3"].shape),
        _resident(fp["w4"].shape), _resident(fp["b4"].shape),
    ]
    out_spec = pl.BlockSpec((tb, out_p), lambda i: (i, 0))

    out = pl.pallas_call(
        _autoencoder_kernel,
        out_shape=jax.ShapeDtypeStruct((b_p, out_p), jnp.float32),
        grid=grid,
        in_specs=in_specs,
        out_specs=out_spec,
        compiler_params=pltpu.CompilerParams(
            dimension_semantics=("parallel",),   # shard batch tiles across TCs on v7x
        ),
    )(x, fp["w1"], fp["b1"], fp["w2"], fp["b2"],
      fp["w3"], fp["b3"], fp["w4"], fp["b4"])

    return out[:B, :fp["out_dim"]]


# ---------------------------------------------------------------------------
# Synthetic parameters + pure-JAX reference (PyTorch eval-mode semantics).
# ---------------------------------------------------------------------------
def init_params(key, input_size, hidden_size_1, hidden_size_2):
    """Deterministic synthetic parameters. Linear weights stored as (in, out)."""
    ks = jax.random.split(key, 24)

    def linear(kw, kb, fan_in, fan_out):
        bound = 1.0 / jnp.sqrt(fan_in)
        w = jax.random.uniform(kw, (fan_in, fan_out), jnp.float32, -bound, bound)
        b = jax.random.uniform(kb, (1, fan_out), jnp.float32, -bound, bound)
        return w, b

    def batchnorm(kg, kb, km, kv, c):
        g = 1.0 + 0.1 * jax.random.normal(kg, (1, c), jnp.float32)
        be = 0.1 * jax.random.normal(kb, (1, c), jnp.float32)
        m = 0.1 * jax.random.normal(km, (1, c), jnp.float32)
        v = 1.0 + 0.5 * jax.random.uniform(kv, (1, c), jnp.float32)
        return g, be, m, v

    p = {}
    p["w1"], p["b1"] = linear(ks[0], ks[1], input_size, hidden_size_1)
    p["g1"], p["be1"], p["m1"], p["v1"] = batchnorm(ks[2], ks[3], ks[4], ks[5], hidden_size_1)
    p["w2"], p["b2"] = linear(ks[6], ks[7], hidden_size_1, hidden_size_2)
    p["g2"], p["be2"], p["m2"], p["v2"] = batchnorm(ks[8], ks[9], ks[10], ks[11], hidden_size_2)
    p["w3"], p["b3"] = linear(ks[12], ks[13], hidden_size_2, hidden_size_1)
    p["g3"], p["be3"], p["m3"], p["v3"] = batchnorm(ks[14], ks[15], ks[16], ks[17], hidden_size_1)
    p["w4"], p["b4"] = linear(ks[18], ks[19], hidden_size_1, input_size)
    return p


def reference_forward(x, p):
    """Pure-JAX reference mirroring the PyTorch module's eval-mode forward."""
    def bn(h, g, be, m, v):
        return (h - m) * (g / jnp.sqrt(v + EPS)) + be

    h = jnp.maximum(x @ p["w1"] + p["b1"], 0.0)
    h = bn(h, p["g1"], p["be1"], p["m1"], p["v1"])
    h = jnp.maximum(h @ p["w2"] + p["b2"], 0.0)
    h = bn(h, p["g2"], p["be2"], p["m2"], p["v2"])
    h = jnp.maximum(h @ p["w3"] + p["b3"], 0.0)
    h = bn(h, p["g3"], p["be3"], p["m3"], p["v3"])
    return h @ p["w4"] + p["b4"]


if __name__ == "__main__":
    # Small shapes consistent with the module's forward (x: [batch, input_size]).
    B = 32
    INPUT_SIZE = 64
    HIDDEN_1 = 32
    HIDDEN_2 = 16

    key = jax.random.PRNGKey(0)
    kx, kp = jax.random.split(key)
    x = jax.random.normal(kx, (B, INPUT_SIZE), jnp.float32)
    params = init_params(kp, INPUT_SIZE, HIDDEN_1, HIDDEN_2)

    # f32 compute path for the correctness check; pass compute_dtype=jnp.bfloat16
    # for large-batch throughput on v6e/v7x.
    folded = fold_and_pad_params(params, compute_dtype=jnp.float32)

    out = my_autoencoder_forward(x, folded, tb=512)
    out = jax.block_until_ready(out)

    ref = reference_forward(x, params)
    assert out.shape == (B, INPUT_SIZE)
    assert jnp.allclose(out, ref, atol=1e-3, rtol=1e-3), "mismatch vs JAX reference"

    print("KERNEL_OK")
</pallas_src>

<mosaic_0001>
module attributes {stable_mosaic.version = 11 : i64} {
  func.func @_autoencoder_kernel(%arg0: i32, %arg1: memref<32x128xf32, #tpu.memory_space<vmem>>, %arg2: memref<128x128xf32, #tpu.memory_space<vmem>>, %arg3: memref<1x128xf32, #tpu.memory_space<vmem>>, %arg4: memref<128x128xf32, #tpu.memory_space<vmem>>, %arg5: memref<1x128xf32, #tpu.memory_space<vmem>>, %arg6: memref<128x128xf32, #tpu.memory_space<vmem>>, %arg7: memref<1x128xf32, #tpu.memory_space<vmem>>, %arg8: memref<128x128xf32, #tpu.memory_space<vmem>>, %arg9: memref<1x128xf32, #tpu.memory_space<vmem>>, %arg10: memref<32x128xf32, #tpu.memory_space<vmem>>) attributes {dimension_semantics = [#tpu.dimension_semantics<parallel>], iteration_bounds = array<i64: 1>, scalar_prefetch = 0 : i64, scratch_operands = 0 : i64, tpu.core_type = #tpu.core_type<tc>, window_params = [{transform_indices = @transform_0, window_bounds = array<i64: 32, 128>}, {pipeline_mode = #tpu.pipeline_mode<synchronous>, transform_indices = @transform_1, window_bounds = array<i64: 128, 128>}, {pipeline_mode = #tpu.pipeline_mode<synchronous>, transform_indices = @transform_2, window_bounds = array<i64: 1, 128>}, {pipeline_mode = #tpu.pipeline_mode<synchronous>, transform_indices = @transform_3, window_bounds = array<i64: 128, 128>}, {pipeline_mode = #tpu.pipeline_mode<synchronous>, transform_indices = @transform_4, window_bounds = array<i64: 1, 128>}, {pipeline_mode = #tpu.pipeline_mode<synchronous>, transform_indices = @transform_5, window_bounds = array<i64: 128, 128>}, {pipeline_mode = #tpu.pipeline_mode<synchronous>, transform_indices = @transform_6, window_bounds = array<i64: 1, 128>}, {pipeline_mode = #tpu.pipeline_mode<synchronous>, transform_indices = @transform_7, window_bounds = array<i64: 128, 128>}, {pipeline_mode = #tpu.pipeline_mode<synchronous>, transform_indices = @transform_8, window_bounds = array<i64: 1, 128>}, {transform_indices = @transform_9, window_bounds = array<i64: 32, 128>}]} {
    %c0 = arith.constant 0 : index
    %c0_0 = arith.constant 0 : index
    %0 = vector.load %arg1[%c0, %c0_0] : memref<32x128xf32, #tpu.memory_space<vmem>>, vector<32x128xf32>
    %c0_1 = arith.constant 0 : index
    %c0_2 = arith.constant 0 : index
    %1 = vector.load %arg2[%c0_1, %c0_2] : memref<128x128xf32, #tpu.memory_space<vmem>>, vector<128x128xf32>
    %cst = arith.constant dense<0.000000e+00> : vector<32x128xf32>
    %2 = tpu.matmul %0, %1, %cst {dimension_numbers = #tpu.dot_dimension_numbers<[1], [0], [0], [1], [0, 0, 1, 1], [], []>} : vector<32x128xf32>, vector<128x128xf32>, vector<32x128xf32> -> vector<32x128xf32>
    %c0_3 = arith.constant 0 : index
    %c0_4 = arith.constant 0 : index
    %3 = vector.load %arg3[%c0_3, %c0_4] : memref<1x128xf32, #tpu.memory_space<vmem>>, vector<1x128xf32>
    %4 = vector.broadcast %3 : vector<1x128xf32> to vector<32x128xf32>
    %5 = arith.addf %2, %4 : vector<32x128xf32>
    %cst_5 = arith.constant 0.000000e+00 : f32
    %6 = vector.broadcast %cst_5 : f32 to vector<32x128xf32>
    %7 = arith.maximumf %5, %6 : vector<32x128xf32>
    %c0_6 = arith.constant 0 : index
    %c0_7 = arith.constant 0 : index
    %8 = vector.load %arg4[%c0_6, %c0_7] : memref<128x128xf32, #tpu.memory_space<vmem>>, vector<128x128xf32>
    %cst_8 = arith.constant dense<0.000000e+00> : vector<32x128xf32>
    %9 = tpu.matmul %7, %8, %cst_8 {dimension_numbers = #tpu.dot_dimension_numbers<[1], [0], [0], [1], [0, 0, 1, 1], [], []>} : vector<32x128xf32>, vector<128x128xf32>, vector<32x128xf32> -> vector<32x128xf32>
    %c0_9 = arith.constant 0 : index
    %c0_10 = arith.constant 0 : index
    %10 = vector.load %arg5[%c0_9, %c0_10] : memref<1x128xf32, #tpu.memory_space<vmem>>, vector<1x128xf32>
    %11 = vector.broadcast %10 : vector<1x128xf32> to vector<32x128xf32>
    %12 = arith.addf %9, %11 : vector<32x128xf32>
    %cst_11 = arith.constant 0.000000e+00 : f32
    %13 = vector.broadcast %cst_11 : f32 to vector<32x128xf32>
    %14 = arith.maximumf %12, %13 : vector<32x128xf32>
    %c0_12 = arith.constant 0 : index
    %c0_13 = arith.constant 0 : index
    %15 = vector.load %arg6[%c0_12, %c0_13] : memref<128x128xf32, #tpu.memory_space<vmem>>, vector<128x128xf32>
    %cst_14 = arith.constant dense<0.000000e+00> : vector<32x128xf32>
    %16 = tpu.matmul %14, %15, %cst_14 {dimension_numbers = #tpu.dot_dimension_numbers<[1], [0], [0], [1], [0, 0, 1, 1], [], []>} : vector<32x128xf32>, vector<128x128xf32>, vector<32x128xf32> -> vector<32x128xf32>
    %c0_15 = arith.constant 0 : index
    %c0_16 = arith.constant 0 : index
    %17 = vector.load %arg7[%c0_15, %c0_16] : memref<1x128xf32, #tpu.memory_space<vmem>>, vector<1x128xf32>
    %18 = vector.broadcast %17 : vector<1x128xf32> to vector<32x128xf32>
    %19 = arith.addf %16, %18 : vector<32x128xf32>
    %cst_17 = arith.constant 0.000000e+00 : f32
    %20 = vector.broadcast %cst_17 : f32 to vector<32x128xf32>
    %21 = arith.maximumf %19, %20 : vector<32x128xf32>
    %c0_18 = arith.constant 0 : index
    %c0_19 = arith.constant 0 : index
    %22 = vector.load %arg8[%c0_18, %c0_19] : memref<128x128xf32, #tpu.memory_space<vmem>>, vector<128x128xf32>
    %cst_20 = arith.constant dense<0.000000e+00> : vector<32x128xf32>
    %23 = tpu.matmul %21, %22, %cst_20 {dimension_numbers = #tpu.dot_dimension_numbers<[1], [0], [0], [1], [0, 0, 1, 1], [], []>} : vector<32x128xf32>, vector<128x128xf32>, vector<32x128xf32> -> vector<32x128xf32>
    %c0_21 = arith.constant 0 : index
    %c0_22 = arith.constant 0 : index
    %24 = vector.load %arg9[%c0_21, %c0_22] : memref<1x128xf32, #tpu.memory_space<vmem>>, vector<1x128xf32>
    %25 = vector.broadcast %24 : vector<1x128xf32> to vector<32x128xf32>
    %26 = arith.addf %23, %25 : vector<32x128xf32>
    %c0_23 = arith.constant 0 : index
    %c0_24 = arith.constant 0 : index
    %27 = vector.load %arg10[%c0_23, %c0_24] : memref<32x128xf32, #tpu.memory_space<vmem>>, vector<32x128xf32>
    tpu.vector_store %arg10[%c0_23, %c0_24], %26 {strides = array<i32>} : memref<32x128xf32, #tpu.memory_space<vmem>>, vector<32x128xf32>,
    return
  }
  func.func @transform_0(%arg0: i32) -> (i32, i32) {
    %c0_i32 = arith.constant 0 : i32
    %c0_i32_0 = arith.constant 0 : i32
    return %arg0, %c0_i32 : i32, i32
  }
  func.func @transform_1(%arg0: i32) -> (i32, i32) {
    %c0_i32 = arith.constant 0 : i32
    %c0_i32_0 = arith.constant 0 : i32
    %c0_i32_1 = arith.constant 0 : i32
    return %c0_i32, %c0_i32_0 : i32, i32
  }
  func.func @transform_2(%arg0: i32) -> (i32, i32) {
    %c0_i32 = arith.constant 0 : i32
    %c0_i32_0 = arith.constant 0 : i32
    %c0_i32_1 = arith.constant 0 : i32
    return %c0_i32, %c0_i32_0 : i32, i32
  }
  func.func @transform_3(%arg0: i32) -> (i32, i32) {
    %c0_i32 = arith.constant 0 : i32
    %c0_i32_0 = arith.constant 0 : i32
    %c0_i32_1 = arith.constant 0 : i32
    return %c0_i32, %c0_i32_0 : i32, i32
  }
  func.func @transform_4(%arg0: i32) -> (i32, i32) {
    %c0_i32 = arith.constant 0 : i32
    %c0_i32_0 = arith.constant 0 : i32
    %c0_i32_1 = arith.constant 0 : i32
    return %c0_i32, %c0_i32_0 : i32, i32
  }
  func.func @transform_5(%arg0: i32) -> (i32, i32) {
    %c0_i32 = arith.constant 0 : i32
    %c0_i32_0 = arith.constant 0 : i32
    %c0_i32_1 = arith.constant 0 : i32
    return %c0_i32, %c0_i32_0 : i32, i32
  }
  func.func @transform_6(%arg0: i32) -> (i32, i32) {
    %c0_i32 = arith.constant 0 : i32
    %c0_i32_0 = arith.constant 0 : i32
    %c0_i32_1 = arith.constant 0 : i32
    return %c0_i32, %c0_i32_0 : i32, i32
  }
  func.func @transform_7(%arg0: i32) -> (i32, i32) {
    %c0_i32 = arith.constant 0 : i32
    %c0_i32_0 = arith.constant 0 : i32
    %c0_i32_1 = arith.constant 0 : i32
    return %c0_i32, %c0_i32_0 : i32, i32
  }
  func.func @transform_8(%arg0: i32) -> (i32, i32) {
    %c0_i32 = arith.constant 0 : i32
    %c0_i32_0 = arith.constant 0 : i32
    %c0_i32_1 = arith.constant 0 : i32
    return %c0_i32, %c0_i32_0 : i32, i32
  }
  func.func @transform_9(%arg0: i32) -> (i32, i32) {
    %c0_i32 = arith.constant 0 : i32
    %c0_i32_0 = arith.constant 0 : i32
    return %arg0, %c0_i32 : i32, i32
  }
}

</mosaic_0001>

<bundles_post_ra>
// kernel: tpu_custom_call.1
= control target key start
LH: loop header
LB: loop body
LE: loop exit
PB: predicated region body
PF: predicated region fallthrough
CT: control target
= control target key end

     0   :  { %14 = vsyncpa [#allocation3], 0  ;;  %s1050_s0 = inlined_call_operand.hbm [shape: f32[32,128], index: 0, kind: input, shape index: {}]   ;;  %s1051_s1 = inlined_call_operand.hbm [shape: f32[128,128], index: 1, kind: input, shape index: {}]   ;;  %s1052_s2 = inlined_call_operand.vmem [shape: f32[1,128], index: 2, kind: input, shape index: {}]   ;;  %s1053_s3 = inlined_call_operand.hbm [shape: f32[128,128], index: 3, kind: input, shape index: {}]   ;;  %s1054_s4 = inlined_call_operand.vmem [shape: f32[1,128], index: 4, kind: input, shape index: {}]   ;;  %s1055_s5 = inlined_call_operand.hbm [shape: f32[128,128], index: 5, kind: input, shape index: {}]   ;;  %s1056_s6 = inlined_call_operand.vmem [shape: f32[1,128], index: 6, kind: input, shape index: {}]   ;;  %s1057_s7 = inlined_call_operand.hbm [shape: f32[128,128], index: 7, kind: input, shape index: {}]   ;;  %s1058_s8 = inlined_call_operand.vmem [shape: f32[1,128], index: 8, kind: input, shape index: {}]   ;;  %s1059_s9 = inlined_call_operand.hbm [shape: f32[32,128], index: 9, kind: output, shape index: {}]  }
   0x1   :  { %15 = vsyncpa [#allocation6], 0 }
   0x2   :  { %16 = vsyncpa [#allocation9], 0 }
   0x3   :  { %17 = vsyncpa [#allocation4], 0  ;;  %s944_s30 = smov [#allocation5]   ;;  %s945_s11 = smov [#allocation8]  }
   0x4   :  { %s35_s10 = sshll.u32 %s944_s30, 4  ;;  %s63_s12 = sshll.u32 %s945_s11, 4  ;;  %s36_s10 = int_to_ptr.vmem [resolvable:$true] %s35_s10  ;;  %s64_s12 = int_to_ptr.vmem [resolvable:$true] %s63_s12 }
   0x5   :  { %s824_s13 = scalar_lea.vmem %s36_s10, 2048  ;;  %p829_p1 = scmp.lt.s32.totalorder %s36_s10, %s36_s10 }
   0x6   :  { %p825_p0 = scmp.ne.s32.totalorder %s36_s10, %s824_s13  ;;  %p830_p2 = scmp.lt.s32.totalorder %s824_s13, %s824_s13 }
   0x8   :  { %p831_p3 = por %p830_p2, %p829_p1 }
   0xa   :  { %p832_p4 = pnand %p831_p3, %p825_p0 }
   0xc   :  { %835 = shalt.err (!%p832_p4)
}
   0xd   :  { %s946_s14 = smov 128   ;;  %s947_s15 = smov 8  }
   0xe   :  { %41 = dma.hbm_to_vmem [thread:$0]  %s1051_s1, 2048, %s36_s10, [#allocation6], %s946_s14, %s946_s14, %s947_s15  }
   0xf   :  { %s844_s18 = scalar_lea.vmem %s64_s12, 2048  ;;  %p849_p6 = scmp.lt.s32.totalorder %s64_s12, %s64_s12 }
  0x10   :  { %p845_p5 = scmp.ne.s32.totalorder %s64_s12, %s844_s18  ;;  %p850_p7 = scmp.lt.s32.totalorder %s844_s18, %s844_s18 }
  0x12   :  { %p851_p8 = por %p850_p7, %p849_p6 }
  0x14   :  { %p852_p9 = pnand %p851_p8, %p845_p5 }
  0x16   :  { %855 = shalt.err (!%p852_p9)
}
  0x17   :  { %69 = dma.hbm_to_vmem [thread:$0]  %s1055_s5, 2048, %s64_s12, [#allocation9], %s946_s14, %s946_s14, %s947_s15  }
  0x18   :  { %s948_s21 = smov [#allocation2]   ;;  %s949_s23 = smov [#allocation7]  }
  0x19   :  { %s23_s22 = sshll.u32 %s948_s21, 4  ;;  %s49_s24 = sshll.u32 %s949_s23, 4  ;;  %s24_s22 = int_to_ptr.vmem [resolvable:$true] %s23_s22  ;;  %s50_s24 = int_to_ptr.vmem [resolvable:$true] %s49_s24 }
  0x1a   :  { %s864_s1 = scalar_lea.vmem %s24_s22, 512  ;;  %p869_p11 = scmp.lt.s32.totalorder %s24_s22, %s24_s22 }
  0x1b   :  { %p865_p10 = scmp.ne.s32.totalorder %s24_s22, %s864_s1  ;;  %p870_p12 = scmp.lt.s32.totalorder %s864_s1, %s864_s1 }
  0x1d   :  { %p871_p13 = por %p870_p12, %p869_p11 }
  0x1f   :  { %p872_p0 = pnand %p871_p13, %p865_p10 }
  0x21   :  { %875 = shalt.err (!%p872_p0)
}
  0x22   :  { %29 = dma.hbm_to_vmem [thread:$0]  %s1050_s0, 512, %s24_s22, [#allocation3], %s946_s14, %s946_s14, %s947_s15  }
  0x23   :  { %s884_s5 = scalar_lea.vmem %s50_s24, 2048  ;;  %p889_p2 = scmp.lt.s32.totalorder %s50_s24, %s50_s24 }
  0x24   :  { %p885_p1 = scmp.ne.s32.totalorder %s50_s24, %s884_s5  ;;  %p890_p3 = scmp.lt.s32.totalorder %s884_s5, %s884_s5 }
  0x26   :  { %p891_p4 = por %p890_p3, %p889_p2 }
  0x28   :  { %p892_p5 = pnand %p891_p4, %p885_p1 }
  0x2a   :  { %895 = shalt.err (!%p892_p5)
}
  0x2b   :  { %55 = dma.hbm_to_vmem [thread:$0]  %s1053_s3, 2048, %s50_s24, [#allocation6], %s946_s14, %s946_s14, %s947_s15  }
  0x2c   :  { %s950_s29 = smov [#allocation10]  }
  0x2d   :  { %s77_s30 = sshll.u32 %s950_s29, 4  ;;  %s78_s30 = int_to_ptr.vmem [resolvable:$true] %s77_s30 }
  0x2e   :  { %s904_s10 = scalar_lea.vmem %s78_s30, 2048  ;;  %p909_p7 = scmp.lt.s32.totalorder %s78_s30, %s78_s30 }
  0x2f   :  { %p905_p6 = scmp.ne.s32.totalorder %s78_s30, %s904_s10  ;;  %p910_p8 = scmp.lt.s32.totalorder %s904_s10, %s904_s10 }
  0x31   :  { %p911_p9 = por %p910_p8, %p909_p7 }
  0x33   :  { %p912_p10 = pnand %p911_p9, %p905_p6 }
  0x35   :  { %915 = shalt.err (!%p912_p10)
}
  0x36   :  { %83 = dma.hbm_to_vmem [thread:$0]  %s1057_s7, 2048, %s78_s30, [#allocation9], %s946_s14, %s946_s14, %s947_s15  }
  0x37   :  { %936 = dma.done.wait [#allocation3], 512  }
  0x38   :  { %937 = vsyncadd [#allocation3], 4294966784 }
  0x39   :  { %938 = dma.done.wait [#allocation6], 4096  }
  0x3a   :  { %939 = vsyncadd [#allocation6], 4294963200 }
  0x3b   :  { %940 = dma.done.wait [#allocation9], 4096  }
  0x3c   :  { %941 = vsyncadd [#allocation9], 4294963200  ;;  %v120_v0 = vld [vmem:[#allocation5 + $0x78] sm:$0xff]  ;;  %v119_v1 = vld [vmem:[#allocation5 + $0x70] sm:$0xff] }
  0x3d   :  { %656 = vmatprep.subr.mxu0 %v120_v0  ;;  %v118_v2 = vld [vmem:[#allocation5 + $0x68] sm:$0xff]  ;;  %v117_v3 = vld [vmem:[#allocation5 + $0x60] sm:$0xff]  ;;  %v116_v5 = vld [vmem:[#allocation5 + $0x58] sm:$0xff] }
  0x3e   :  { %657 = vmatpush3.msra.mxu0 %v120_v0  ;;  %v101_v4 = vld [vmem:[#allocation2] sm:$0xff]  ;;  %v232_v6 = vld [vmem:[#allocation7 + $0x78] sm:$0xff]  ;;  %v231_v7 = vld [vmem:[#allocation7 + $0x70] sm:$0xff] }
  0x3f   :  { %658 = vmatprep.subr.mxu0 %v119_v1  ;;  %688 = vmatprep.mubr.f32.mxu0 %v101_v4  ;;  %v115_v8 = vld [vmem:[#allocation5 + $0x50] sm:$0xff]  ;;  %v230_v9 = vld [vmem:[#allocation7 + $0x68] sm:$0xff]  ;;  %v229_v11 = vld [vmem:[#allocation7 + $0x60] sm:$0xff] }
  0x40   :  { %659 = vmatpush3.msra.mxu0 %v119_v1  ;;  %694 = vmatprep.subr.mxu1 %v232_v6  ;;  %v114_v10 = vld [vmem:[#allocation5 + $0x48] sm:$0xff]  ;;  %v113_v12 = vld [vmem:[#allocation5 + $0x40] sm:$0xff]  ;;  %v228_v13 = vld [vmem:[#allocation7 + $0x58] sm:$0xff] }
  0x41   :  { %660 = vmatprep.subr.mxu0 %v118_v2  ;;  %695 = vmatpush3.msra.mxu1 %v232_v6  ;;  %v112_v14 = vld [vmem:[#allocation5 + $0x38] sm:$0xff]  ;;  %v227_v15 = vld [vmem:[#allocation7 + $0x50] sm:$0xff]  ;;  %v226_v17 = vld [vmem:[#allocation7 + $0x48] sm:$0xff] }
  0x42   :  { %661 = vmatpush3.msra.mxu0 %v118_v2  ;;  %696 = vmatprep.subr.mxu1 %v231_v7  ;;  %v111_v16 = vld [vmem:[#allocation5 + $0x30] sm:$0xff]  ;;  %v110_v18 = vld [vmem:[#allocation5 + $0x28] sm:$0xff]  ;;  %v225_v19 = vld [vmem:[#allocation7 + $0x40] sm:$0xff] }
  0x43   :  { %662 = vmatprep.subr.mxu0 %v117_v3  ;;  %697 = vmatpush3.msra.mxu1 %v231_v7  ;;  %v109_v20 = vld [vmem:[#allocation5 + $0x20] sm:$0xff]  ;;  %v224_v21 = vld [vmem:[#allocation7 + $0x38] sm:$0xff]  ;;  %v223_v23 = vld [vmem:[#allocation7 + $0x30] sm:$0xff] }
  0x44   :  { %663 = vmatpush3.msra.mxu0 %v117_v3  ;;  %698 = vmatprep.subr.mxu1 %v230_v9  ;;  %v108_v22 = vld [vmem:[#allocation5 + $0x18] sm:$0xff]  ;;  %v107_v24 = vld [vmem:[#allocation5 + $0x10] sm:$0xff]  ;;  %v222_v25 = vld [vmem:[#allocation7 + $0x28] sm:$0xff] }
  0x45   :  { %664 = vmatprep.subr.mxu0 %v116_v5  ;;  %699 = vmatpush3.msra.mxu1 %v230_v9  ;;  %v106_v26 = vld [vmem:[#allocation5 + $0x8] sm:$0xff]  ;;  %v221_v27 = vld [vmem:[#allocation7 + $0x20] sm:$0xff]  ;;  %v103_v30 = vld [vmem:[#allocation2 + $0x10] sm:$0xff] }
  0x46   :  { %665 = vmatpush3.msra.mxu0 %v116_v5  ;;  %700 = vmatprep.subr.mxu1 %v229_v11  ;;  %v105_v28 = vld [vmem:[#allocation5] sm:$0xff]  ;;  %v102_v29 = vld [vmem:[#allocation2 + $0x8] sm:$0xff]  ;;  %v104_v31 = vld [vmem:[#allocation2 + $0x18] sm:$0xff] }
  0x47   :  { %666 = vmatprep.subr.mxu0 %v115_v8  ;;  %701 = vmatpush3.msra.mxu1 %v229_v11  ;;  %v220_v32 = vld [vmem:[#allocation7 + $0x18] sm:$0xff]  ;;  %v219_v33 = vld [vmem:[#allocation7 + $0x10] sm:$0xff]  ;;  %v218_v34 = vld [vmem:[#allocation7 + $0x8] sm:$0xff] }
  0x48   :  { %667 = vmatpush3.msra.mxu0 %v115_v8  ;;  %702 = vmatprep.subr.mxu1 %v228_v13  ;;  %v217_v35 = vld [vmem:[#allocation7] sm:$0xff]  ;;  %v344_v36 = vld [vmem:[#allocation8 + $0x78] sm:$0xff]  ;;  %v343_v37 = vld [vmem:[#allocation8 + $0x70] sm:$0xff] }
  0x49   :  { %668 = vmatprep.subr.mxu0 %v114_v10  ;;  %703 = vmatpush3.msra.mxu1 %v228_v13  ;;  %v342_v38 = vld [vmem:[#allocation8 + $0x68] sm:$0xff]  ;;  %v341_v39 = vld [vmem:[#allocation8 + $0x60] sm:$0xff]  ;;  %v340_v40 = vld [vmem:[#allocation8 + $0x58] sm:$0xff] }
  0x4a   :  { %669 = vmatpush3.msra.mxu0 %v114_v10  ;;  %704 = vmatprep.subr.mxu1 %v227_v15  ;;  %v339_v41 = vld [vmem:[#allocation8 + $0x50] sm:$0xff]  ;;  %v338_v42 = vld [vmem:[#allocation8 + $0x48] sm:$0xff]  ;;  %v337_v43 = vld [vmem:[#allocation8 + $0x40] sm:$0xff] }
  0x4b   :  { %670 = vmatprep.subr.mxu0 %v113_v12  ;;  %705 = vmatpush3.msra.mxu1 %v227_v15  ;;  %v336_v44 = vld [vmem:[#allocation8 + $0x38] sm:$0xff]  ;;  %v335_v45 = vld [vmem:[#allocation8 + $0x30] sm:$0xff]  ;;  %v334_v46 = vld [vmem:[#allocation8 + $0x28] sm:$0xff] }
  0x4c   :  { %671 = vmatpush3.msra.mxu0 %v113_v12  ;;  %706 = vmatprep.subr.mxu1 %v226_v17  ;;  %v333_v47 = vld [vmem:[#allocation8 + $0x20] sm:$0xff]  ;;  %v332_v61 = vld [vmem:[#allocation8 + $0x18] sm:$0xff]  ;;  %v331_v62 = vld [vmem:[#allocation8 + $0x10] sm:$0xff] }
  0x4d   :  { %672 = vmatprep.subr.mxu0 %v112_v14  ;;  %707 = vmatpush3.msra.mxu1 %v226_v17  ;;  %v572_v48 = vld [vmem:[%s1052_s2] ss:$0 sm:$0xff]  ;;  %v330_v63 = vld [vmem:[#allocation8 + $0x8] sm:$0xff]  ;;  %v456_v1 = vld [vmem:[#allocation10 + $0x78] sm:$0xff] }
  0x4e   :  { %673 = vmatpush3.msra.mxu0 %v112_v14  ;;  %708 = vmatprep.subr.mxu1 %v225_v19  ;;  %v329_v0 = vld [vmem:[#allocation8] sm:$0xff]  ;;  %v455_v2 = vld [vmem:[#allocation10 + $0x70] sm:$0xff]  ;;  %v454_v3 = vld [vmem:[#allocation10 + $0x68] sm:$0xff] }
  0x4f   :  { %674 = vmatprep.subr.mxu0 %v111_v16  ;;  %709 = vmatpush3.msra.mxu1 %v225_v19  ;;  %v453_v4 = vld [vmem:[#allocation10 + $0x60] sm:$0xff]  ;;  %v452_v5 = vld [vmem:[#allocation10 + $0x58] sm:$0xff]  ;;  %v451_v6 = vld [vmem:[#allocation10 + $0x50] sm:$0xff] }
  0x50   :  { %675 = vmatpush3.msra.mxu0 %v111_v16  ;;  %710 = vmatprep.subr.mxu1 %v224_v21  ;;  %v450_v7 = vld [vmem:[#allocation10 + $0x48] sm:$0xff]  ;;  %v449_v8 = vld [vmem:[#allocation10 + $0x40] sm:$0xff]  ;;  %v448_v9 = vld [vmem:[#allocation10 + $0x38] sm:$0xff] }
  0x51   :  { %676 = vmatprep.subr.mxu0 %v110_v18  ;;  %711 = vmatpush3.msra.mxu1 %v224_v21  ;;  %v447_v10 = vld [vmem:[#allocation10 + $0x30] sm:$0xff]  ;;  %v446_v11 = vld [vmem:[#allocation10 + $0x28] sm:$0xff]  ;;  %v445_v12 = vld [vmem:[#allocation10 + $0x20] sm:$0xff] }
  0x52   :  { %677 = vmatpush3.msra.mxu0 %v110_v18  ;;  %712 = vmatprep.subr.mxu1 %v223_v23  ;;  %v573_v13 = vld [vmem:[%s1054_s4] ss:$0 sm:$0xff] }
  0x53   :  { %678 = vmatprep.subr.mxu0 %v109_v20  ;;  %713 = vmatpush3.msra.mxu1 %v223_v23 }
  0x54   :  { %679 = vmatpush3.msra.mxu0 %v109_v20  ;;  %714 = vmatprep.subr.mxu1 %v222_v25 }
  0x55   :  { %680 = vmatprep.subr.mxu0 %v108_v22  ;;  %715 = vmatpush3.msra.mxu1 %v222_v25 }
  0x56   :  { %681 = vmatpush3.msra.mxu0 %v108_v22  ;;  %716 = vmatprep.subr.mxu1 %v221_v27 }
  0x57   :  { %682 = vmatprep.subr.mxu0 %v107_v24  ;;  %717 = vmatpush3.msra.mxu1 %v221_v27  ;;  %v443_v27 = vld [vmem:[#allocation10 + $0x10] sm:$0xff] }
  0x58   :  { %683 = vmatpush3.msra.mxu0 %v107_v24  ;;  %718 = vmatprep.subr.mxu1 %v220_v32 }
  0x59   :  { %684 = vmatprep.subr.mxu0 %v106_v26  ;;  %719 = vmatpush3.msra.mxu1 %v220_v32 }
  0x5a   :  { %685 = vmatpush3.msra.mxu0 %v106_v26  ;;  %720 = vmatprep.subr.mxu1 %v219_v33  ;;  %v444_v26 = vld [vmem:[#allocation10 + $0x18] sm:$0xff] }
  0x5b   :  { %686 = vmatprep.subr.mxu0 %v105_v28  ;;  %721 = vmatpush3.msra.mxu1 %v219_v33 }
  0x5c   :  { %687 = vmatpush3.msra.mxu0 %v105_v28  ;;  %722 = vmatprep.subr.mxu1 %v218_v34  ;;  %v442_v28 = vld [vmem:[#allocation10 + $0x8] sm:$0xff] }
  0x5d   :  { %689 = vmatmul.mubr.f32.vlgmr.msra.gmra.mxu0 %v102_v29  ;;  %723 = vmatpush3.msra.mxu1 %v218_v34  ;;  %v441_v29 = vld [vmem:[#allocation10] sm:$0xff] }
  0x5e   :  { %691 = vmatprep.mubr.f32.mxu0 %v103_v30  ;;  %724 = vmatprep.subr.mxu1 %v217_v35  ;;  %v574_v30 = vld [vmem:[%s1056_s6] ss:$0 sm:$0xff]  ;;  %s951_s6 = smov [#allocation11]  }
  0x5f   :  { %725 = vmatpush3.msra.mxu1 %v217_v35  ;;  %732 = vmatprep.subr.mxu0 %v344_v36  ;;  %s558_s18 = sshll.u32 %s951_s6, 4  ;;  %s559_s18 = int_to_ptr.vmem [resolvable:$true] %s558_s18 }
  0x60   :  { %733 = vmatpush3.msra.mxu0 %v344_v36  ;;  %770 = vmatprep.subr.mxu1 %v456_v1  ;;  %s916_s19 = scalar_lea.vmem %s559_s18, 512  ;;  %p921_p12 = scmp.lt.s32.totalorder %s559_s18, %s559_s18 }
  0x61   :  { %692 = vmatmul.mubr.f32.gmra.mxu0 %v104_v31  ;;  %734 = vmatprep.subr.mxu0 %v343_v37  ;;  %p917_p11 = scmp.ne.s32.totalorder %s559_s18, %s916_s19  ;;  %p922_p13 = scmp.lt.s32.totalorder %s916_s19, %s916_s19 }
  0x62   :  { %735 = vmatpush3.msra.mxu0 %v343_v37 }
  0x63   :  { %736 = vmatprep.subr.mxu0 %v342_v38  ;;  %p923_p0 = por %p922_p13, %p921_p12 }
  0x64   :  { %737 = vmatpush3.msra.mxu0 %v342_v38 }
  0x65   :  { %738 = vmatprep.subr.mxu0 %v341_v39  ;;  %p924_p1 = pnand %p923_p0, %p917_p11 }
  0x66   :  { %739 = vmatpush3.msra.mxu0 %v341_v39 }
  0x67   :  { %740 = vmatprep.subr.mxu0 %v340_v40 }
  0x68   :  { %741 = vmatpush3.msra.mxu0 %v340_v40 }
  0x69   :  { %742 = vmatprep.subr.mxu0 %v339_v41 }
  0x6a   :  { %743 = vmatpush3.msra.mxu0 %v339_v41 }
  0x6b   :  { %744 = vmatprep.subr.mxu0 %v338_v42 }
  0x6c   :  { %745 = vmatpush3.msra.mxu0 %v338_v42 }
  0x6d   :  { %746 = vmatprep.subr.mxu0 %v337_v43 }
  0x6e   :  { %747 = vmatpush3.msra.mxu0 %v337_v43  ;;  %v575_v43 = vld [vmem:[%s1058_s8] ss:$0 sm:$0xff] }
  0x6f   :  { %748 = vmatprep.subr.mxu0 %v336_v44 }
  0x70   :  { %749 = vmatpush3.msra.mxu0 %v336_v44 }
  0x71   :  { %750 = vmatprep.subr.mxu0 %v335_v45 }
  0x72   :  { %751 = vmatpush3.msra.mxu0 %v335_v45 }
  0x73   :  { %752 = vmatprep.subr.mxu0 %v334_v46 }
  0x74   :  { %753 = vmatpush3.msra.mxu0 %v334_v46 }
  0x75   :  { %754 = vmatprep.subr.mxu0 %v333_v47 }
  0x76   :  { %755 = vmatpush3.msra.mxu0 %v333_v47 }
  0x77   :  { %756 = vmatprep.subr.mxu0 %v332_v61 }
  0x78   :  { %757 = vmatpush3.msra.mxu0 %v332_v61 }
  0x79   :  { %758 = vmatprep.subr.mxu0 %v331_v62 }
  0x7a   :  { %759 = vmatpush3.msra.mxu0 %v331_v62 }
  0x7b   :  { %760 = vmatprep.subr.mxu0 %v330_v63 }
  0x7c   :  { %761 = vmatpush3.msra.mxu0 %v330_v63 }
  0x7d   :  { %762 = vmatprep.subr.mxu0 %v329_v0 }
  0x7e   :  { %763 = vmatpush3.msra.mxu0 %v329_v0 }
 0x11d   :  { %v690_v49 = vpop.f32.mrf.mxu0 }
 0x11e   :  { %v200_v50 = vadd.f32 %v690_v49, %v572_v48 }
 0x11f   :  { %v194_v51 = vpop.f32.mrf.mxu0 }
 0x120   :  { %v195_v52 = vadd.f32 %v572_v48, %v194_v51  ;;  %v214_v55 = vmax.f32 %v200_v50, 0.0 }
 0x121   :  { %v693_v53 = vpop.f32.mrf.mxu0 }
 0x122   :  { %v213_v54 = vmax.f32 %v195_v52, 0.0  ;;  %v210_v56 = vadd.f32 %v693_v53, %v572_v48 }
 0x123   :  { %v204_v57 = vpop.f32.mrf.mxu0 }
 0x124   :  { %v205_v58 = vadd.f32 %v572_v48, %v204_v57  ;;  %726 = vmatprep.mubr.f32.mxu1 %v213_v54  ;;  %v216_v60 = vmax.f32 %v210_v56, 0.0 }
 0x125   :  { %727 = vmatmul.mubr.f32.vlgmr.msra.gmra.mxu1 %v214_v55 }
 0x126   :  { %v215_v59 = vmax.f32 %v205_v58, 0.0  ;;  %771 = vmatpush3.msra.mxu1 %v456_v1 }
 0x127   :  { %772 = vmatprep.subr.mxu1 %v455_v2 }
 0x128   :  { %729 = vmatprep.mubr.f32.mxu1 %v215_v59  ;;  %773 = vmatpush3.msra.mxu1 %v455_v2 }
 0x129   :  { %730 = vmatmul.mubr.f32.gmra.mxu1 %v216_v60  ;;  %774 = vmatprep.subr.mxu1 %v454_v3 }
 0x12a   :  { %775 = vmatpush3.msra.mxu1 %v454_v3 }
 0x12b   :  { %776 = vmatprep.subr.mxu1 %v453_v4 }
 0x12c   :  { %777 = vmatpush3.msra.mxu1 %v453_v4 }
 0x12d   :  { %778 = vmatprep.subr.mxu1 %v452_v5 }
 0x12e   :  { %779 = vmatpush3.msra.mxu1 %v452_v5 }
 0x12f   :  { %780 = vmatprep.subr.mxu1 %v451_v6 }
 0x130   :  { %781 = vmatpush3.msra.mxu1 %v451_v6 }
 0x131   :  { %782 = vmatprep.subr.mxu1 %v450_v7 }
 0x132   :  { %783 = vmatpush3.msra.mxu1 %v450_v7 }
 0x133   :  { %784 = vmatprep.subr.mxu1 %v449_v8 }
 0x134   :  { %785 = vmatpush3.msra.mxu1 %v449_v8 }
 0x135   :  { %786 = vmatprep.subr.mxu1 %v448_v9 }
 0x136   :  { %787 = vmatpush3.msra.mxu1 %v448_v9 }
 0x137   :  { %788 = vmatprep.subr.mxu1 %v447_v10 }
 0x138   :  { %789 = vmatpush3.msra.mxu1 %v447_v10 }
 0x139   :  { %790 = vmatprep.subr.mxu1 %v446_v11 }
 0x13a   :  { %791 = vmatpush3.msra.mxu1 %v446_v11 }
 0x13b   :  { %792 = vmatprep.subr.mxu1 %v445_v12 }
 0x13c   :  { %793 = vmatpush3.msra.mxu1 %v445_v12 }
 0x13d   :  { %794 = vmatprep.subr.mxu1 %v444_v26 }
 0x13e   :  { %795 = vmatpush3.msra.mxu1 %v444_v26 }
 0x13f   :  { %796 = vmatprep.subr.mxu1 %v443_v27 }
 0x140   :  { %797 = vmatpush3.msra.mxu1 %v443_v27 }
 0x141   :  { %798 = vmatprep.subr.mxu1 %v442_v28 }
 0x142   :  { %799 = vmatpush3.msra.mxu1 %v442_v28 }
 0x143   :  { %800 = vmatprep.subr.mxu1 %v441_v29 }
 0x144   :  { %801 = vmatpush3.msra.mxu1 %v441_v29 }
 0x1e5   :  { %v728_v14 = vpop.f32.mrf.mxu1 }
 0x1e6   :  { %v312_v15 = vadd.f32 %v728_v14, %v573_v13 }
 0x1e7   :  { %v306_v16 = vpop.f32.mrf.mxu1 }
 0x1e8   :  { %v307_v17 = vadd.f32 %v573_v13, %v306_v16  ;;  %v326_v20 = vmax.f32 %v312_v15, 0.0 }
 0x1e9   :  { %v731_v18 = vpop.f32.mrf.mxu1 }
 0x1ea   :  { %v325_v19 = vmax.f32 %v307_v17, 0.0  ;;  %v322_v21 = vadd.f32 %v731_v18, %v573_v13 }
 0x1eb   :  { %v316_v22 = vpop.f32.mrf.mxu1 }
 0x1ec   :  { %v317_v23 = vadd.f32 %v573_v13, %v316_v22  ;;  %764 = vmatprep.mubr.f32.mxu0 %v325_v19  ;;  %v328_v25 = vmax.f32 %v322_v21, 0.0 }
 0x1ed   :  { %765 = vmatmul.mubr.f32.vlgmr.msra.gmra.mxu0 %v326_v20 }
 0x1ee   :  { %v327_v24 = vmax.f32 %v317_v23, 0.0 }
 0x1f0   :  { %767 = vmatprep.mubr.f32.mxu0 %v327_v24 }
 0x1f1   :  { %768 = vmatmul.mubr.f32.gmra.mxu0 %v328_v25 }
 0x2ad   :  { %v766_v31 = vpop.f32.mrf.mxu0 }
 0x2ae   :  { %v424_v32 = vadd.f32 %v766_v31, %v574_v30 }
 0x2af   :  { %v418_v33 = vpop.f32.mrf.mxu0 }
 0x2b0   :  { %v419_v34 = vadd.f32 %v574_v30, %v418_v33  ;;  %v438_v37 = vmax.f32 %v424_v32, 0.0 }
 0x2b1   :  { %v769_v35 = vpop.f32.mrf.mxu0 }
 0x2b2   :  { %v437_v36 = vmax.f32 %v419_v34, 0.0  ;;  %v434_v38 = vadd.f32 %v769_v35, %v574_v30 }
 0x2b3   :  { %v428_v39 = vpop.f32.mrf.mxu0 }
 0x2b4   :  { %v429_v40 = vadd.f32 %v574_v30, %v428_v39  ;;  %802 = vmatprep.mubr.f32.mxu1 %v437_v36  ;;  %v440_v42 = vmax.f32 %v434_v38, 0.0 }
 0x2b5   :  { %803 = vmatmul.mubr.f32.vlgmr.msra.gmra.mxu1 %v438_v37 }
 0x2b6   :  { %v439_v41 = vmax.f32 %v429_v40, 0.0 }
 0x2b8   :  { %805 = vmatprep.mubr.f32.mxu1 %v439_v41 }
 0x2b9   :  { %806 = vmatmul.mubr.f32.gmra.mxu1 %v440_v42 }
 0x375   :  { %v804_v44 = vpop.f32.mrf.mxu1 }
 0x376   :  { %v536_v45 = vadd.f32 %v804_v44, %v575_v43 }
 0x377   :  { %v530_v46 = vpop.f32.mrf.mxu1 }
 0x378   :  { %550 = vst [vmem:[#allocation11 + $0x8] sm:$0xff] %v536_v45  ;;  %v531_v47 = vadd.f32 %v575_v43, %v530_v46 }
 0x379   :  { %v807_v48 = vpop.f32.mrf.mxu1 }
 0x37a   :  { %549 = vst [vmem:[#allocation11] sm:$0xff] %v531_v47  ;;  %v546_v49 = vadd.f32 %v807_v48, %v575_v43 }
 0x37b   :  { %v540_v50 = vpop.f32.mrf.mxu1 }
 0x37c   :  { %552 = vst [vmem:[#allocation11 + $0x18] sm:$0xff] %v546_v49  ;;  %v541_v51 = vadd.f32 %v575_v43, %v540_v50 }
 0x37e   :  { %551 = vst [vmem:[#allocation11 + $0x10] sm:$0xff] %v541_v51 }
 0x37f   :  { %927 = shalt.err (!%p924_p1)
}
 0x380   :  { %564 = dma.vmem_to_hbm [thread:$0]  %s559_s18, 512, %s1059_s9, [#allocation4], %s946_s14, %s946_s14, %s947_s15  }
 0x381   :  { %942 = dma.done.wait [#allocation4], 512  }
 0x382   :  { %943 = vsyncadd [#allocation4], 4294966784 }
 0x383   :  { %568 = vsyncpa [#allocation3], 1 }
 0x384   :  { %569 = vsyncpa [#allocation6], 1 }
 0x385   :  { %570 = vsyncpa [#allocation9], 1 }
 0x386   :  { %571 = vsyncpa [#allocation4], 1 }

</bundles_post_ra>
